<compile_context>
chip_gen: v5e
topology: v5e:2x2
jax: 0.10.0
libtpu: 0.0.40
codegen_flags: <defaults>
</compile_context>

<pallas_src>
import jax
import jax.numpy as jnp
from jax.experimental import pallas as pl
from jax.experimental.pallas import tpu as pltpu


def _round_up(n: int, m: int) -> int:
    return ((n + m - 1) // m) * m


def _decoder_kernel(x_ref, w1_ref, b1_ref, w2_ref, b2_ref, o_ref):
    # h = relu(x @ W1 + b1)   -- bf16 operands, f32 accumulate on the MXU.
    h = jnp.dot(x_ref[...], w1_ref[...], preferred_element_type=jnp.float32)
    h = jnp.maximum(h + b1_ref[...], 0.0)          # f32 bias + ReLU (VPU)
    # out = h @ W2 + b2       -- cast h to bf16 only after the f32 epilogue.
    h = h.astype(w2_ref.dtype)
    out = jnp.dot(h, w2_ref[...], preferred_element_type=jnp.float32)
    o_ref[...] = (out + b2_ref[...]).astype(o_ref.dtype)


def decoder_forward(x, w1, b1, w2, b2, *, block_m: int = 512):
    """Fused two-layer MLP (Linear -> ReLU -> Linear) in one Pallas kernel.

    x : (B, L)  f32     w1: (L, H)  w2: (H, O)   (stored as PyTorch weight.T)
    Returns (B, O) f32.
    """
    B, L = x.shape
    H = w1.shape[1]
    O = w2.shape[1]

    # Lane-dense feature padding (multiples of 128); zero pads contribute 0.
    Hp = _round_up(H, 128)
    Op = _round_up(O, 128)

    # Batch tile: multiple of 16 (bf16 sublane pack), capped at block_m.
    tm = max(16, min(block_m, _round_up(B, 16)))
    Bp = _round_up(B, tm)
    grid = (Bp // tm,)

    # Pre-cast / pre-pad once in the wrapper (weights stay resident in VMEM).
    x_p = jnp.pad(x, ((0, Bp - B), (0, 0))).astype(jnp.bfloat16)
    w1_p = jnp.pad(w1, ((0, 0), (0, Hp - H))).astype(jnp.bfloat16)
    b1_p = jnp.pad(b1, ((0, Hp - H),)).reshape(1, Hp).astype(jnp.float32)
    w2_p = jnp.pad(w2, ((0, Hp - H), (0, Op - O))).astype(jnp.bfloat16)
    b2_p = jnp.pad(b2, ((0, Op - O),)).reshape(1, Op).astype(jnp.float32)

    flops = 2 * Bp * (L * Hp + Hp * Op)
    bytes_accessed = (
        Bp * L * 2          # x (bf16)
        + L * Hp * 2        # w1 (bf16)
        + Hp * 4            # b1 (f32)
        + Hp * Op * 2       # w2 (bf16)
        + Op * 4            # b2 (f32)
        + Bp * Op * 4       # out (f32)
    )

    out_padded = pl.pallas_call(
        _decoder_kernel,
        out_shape=jax.ShapeDtypeStruct((Bp, Op), jnp.float32),
        grid=grid,
        in_specs=[
            pl.BlockSpec((tm, L), lambda i: (i, 0)),    # x: streamed per tile
            pl.BlockSpec((L, Hp), lambda i: (0, 0)),    # W1: resident
            pl.BlockSpec((1, Hp), lambda i: (0, 0)),    # b1: resident
            pl.BlockSpec((Hp, Op), lambda i: (0, 0)),   # W2: resident
            pl.BlockSpec((1, Op), lambda i: (0, 0)),    # b2: resident
        ],
        out_specs=pl.BlockSpec((tm, Op), lambda i: (i, 0)),
        compiler_params=pltpu.CompilerParams(
            dimension_semantics=("parallel",),
        ),
        cost_estimate=pl.CostEstimate(
            flops=flops, transcendentals=0, bytes_accessed=bytes_accessed
        ),
    )(x_p, w1_p, b1_p, w2_p, b2_p)

    return out_padded[:B, :O]


def _reference(x, w1, b1, w2, b2):
    h = jnp.maximum(x @ w1 + b1, 0.0)
    return h @ w2 + b2


if __name__ == "__main__":
    # Small shapes implied by the module: latent -> hidden -> output MLP.
    batch, latent_dim, hidden_dim, output_dim = 8, 16, 32, 64

    key = jax.random.PRNGKey(0)
    k_x, k_w1, k_b1, k_w2, k_b2 = jax.random.split(key, 5)

    x = jax.random.normal(k_x, (batch, latent_dim), dtype=jnp.float32)
    # Deterministic "Kaiming-ish" init; stored as (in, out) = PyTorch weight.T
    w1 = jax.random.normal(k_w1, (latent_dim, hidden_dim), jnp.float32) * 0.1
    b1 = jax.random.normal(k_b1, (hidden_dim,), jnp.float32) * 0.01
    w2 = jax.random.normal(k_w2, (hidden_dim, output_dim), jnp.float32) * 0.1
    b2 = jax.random.normal(k_b2, (output_dim,), jnp.float32) * 0.01

    out = decoder_forward(x, w1, b1, w2, b2)
    out = jax.block_until_ready(out)

    ref = _reference(x, w1, b1, w2, b2)
    assert out.shape == (batch, output_dim)
    # bf16 MXU inputs with f32 accumulation: loosened tolerance vs f32 reference.
    assert jnp.allclose(out, ref, atol=2e-2, rtol=2e-2), "mismatch vs reference"

    print("KERNEL_OK")
</pallas_src>

<mosaic_0001>
module attributes {stable_mosaic.version = 11 : i64} {
  func.func @_decoder_kernel(%arg0: i32, %arg1: memref<16x16xbf16, #tpu.memory_space<vmem>>, %arg2: memref<16x128xbf16, #tpu.memory_space<vmem>>, %arg3: memref<1x128xf32, #tpu.memory_space<vmem>>, %arg4: memref<128x128xbf16, #tpu.memory_space<vmem>>, %arg5: memref<1x128xf32, #tpu.memory_space<vmem>>, %arg6: memref<16x128xf32, #tpu.memory_space<vmem>>) attributes {dimension_semantics = [#tpu.dimension_semantics<parallel>], iteration_bounds = array<i64: 1>, scalar_prefetch = 0 : i64, scratch_operands = 0 : i64, tpu.core_type = #tpu.core_type<tc>, window_params = [{transform_indices = @transform_0, window_bounds = array<i64: 16, 16>}, {pipeline_mode = #tpu.pipeline_mode<synchronous>, transform_indices = @transform_1, window_bounds = array<i64: 16, 128>}, {pipeline_mode = #tpu.pipeline_mode<synchronous>, transform_indices = @transform_2, window_bounds = array<i64: 1, 128>}, {pipeline_mode = #tpu.pipeline_mode<synchronous>, transform_indices = @transform_3, window_bounds = array<i64: 128, 128>}, {pipeline_mode = #tpu.pipeline_mode<synchronous>, transform_indices = @transform_4, window_bounds = array<i64: 1, 128>}, {transform_indices = @transform_5, window_bounds = array<i64: 16, 128>}]} {
    %c0 = arith.constant 0 : index
    %c0_0 = arith.constant 0 : index
    %0 = vector.load %arg1[%c0, %c0_0] : memref<16x16xbf16, #tpu.memory_space<vmem>>, vector<16x16xbf16>
    %c0_1 = arith.constant 0 : index
    %c0_2 = arith.constant 0 : index
    %1 = vector.load %arg2[%c0_1, %c0_2] : memref<16x128xbf16, #tpu.memory_space<vmem>>, vector<16x128xbf16>
    %cst = arith.constant dense<0.000000e+00> : vector<16x128xf32>
    %2 = tpu.matmul %0, %1, %cst {dimension_numbers = #tpu.dot_dimension_numbers<[1], [0], [0], [1], [0, 0, 1, 1], [], []>} : vector<16x16xbf16>, vector<16x128xbf16>, vector<16x128xf32> -> vector<16x128xf32>
    %c0_3 = arith.constant 0 : index
    %c0_4 = arith.constant 0 : index
    %3 = vector.load %arg3[%c0_3, %c0_4] : memref<1x128xf32, #tpu.memory_space<vmem>>, vector<1x128xf32>
    %4 = vector.broadcast %3 : vector<1x128xf32> to vector<16x128xf32>
    %5 = arith.addf %2, %4 : vector<16x128xf32>
    %cst_5 = arith.constant 0.000000e+00 : f32
    %6 = vector.broadcast %cst_5 : f32 to vector<16x128xf32>
    %7 = arith.maximumf %5, %6 : vector<16x128xf32>
    %8 = arith.truncf %7 : vector<16x128xf32> to vector<16x128xbf16>
    %c0_6 = arith.constant 0 : index
    %c0_7 = arith.constant 0 : index
    %9 = vector.load %arg4[%c0_6, %c0_7] : memref<128x128xbf16, #tpu.memory_space<vmem>>, vector<128x128xbf16>
    %cst_8 = arith.constant dense<0.000000e+00> : vector<16x128xf32>
    %10 = tpu.matmul %8, %9, %cst_8 {dimension_numbers = #tpu.dot_dimension_numbers<[1], [0], [0], [1], [0, 0, 1, 1], [], []>} : vector<16x128xbf16>, vector<128x128xbf16>, vector<16x128xf32> -> vector<16x128xf32>
    %c0_9 = arith.constant 0 : index
    %c0_10 = arith.constant 0 : index
    %11 = vector.load %arg5[%c0_9, %c0_10] : memref<1x128xf32, #tpu.memory_space<vmem>>, vector<1x128xf32>
    %12 = vector.broadcast %11 : vector<1x128xf32> to vector<16x128xf32>
    %13 = arith.addf %10, %12 : vector<16x128xf32>
    %c0_11 = arith.constant 0 : index
    %c0_12 = arith.constant 0 : index
    %14 = vector.load %arg6[%c0_11, %c0_12] : memref<16x128xf32, #tpu.memory_space<vmem>>, vector<16x128xf32>
    tpu.vector_store %arg6[%c0_11, %c0_12], %13 {strides = array<i32>} : memref<16x128xf32, #tpu.memory_space<vmem>>, vector<16x128xf32>,
    return
  }
  func.func @transform_0(%arg0: i32) -> (i32, i32) {
    %c0_i32 = arith.constant 0 : i32
    %c0_i32_0 = arith.constant 0 : i32
    return %arg0, %c0_i32 : i32, i32
  }
  func.func @transform_1(%arg0: i32) -> (i32, i32) {
    %c0_i32 = arith.constant 0 : i32
    %c0_i32_0 = arith.constant 0 : i32
    %c0_i32_1 = arith.constant 0 : i32
    return %c0_i32, %c0_i32_0 : i32, i32
  }
  func.func @transform_2(%arg0: i32) -> (i32, i32) {
    %c0_i32 = arith.constant 0 : i32
    %c0_i32_0 = arith.constant 0 : i32
    %c0_i32_1 = arith.constant 0 : i32
    return %c0_i32, %c0_i32_0 : i32, i32
  }
  func.func @transform_3(%arg0: i32) -> (i32, i32) {
    %c0_i32 = arith.constant 0 : i32
    %c0_i32_0 = arith.constant 0 : i32
    %c0_i32_1 = arith.constant 0 : i32
    return %c0_i32, %c0_i32_0 : i32, i32
  }
  func.func @transform_4(%arg0: i32) -> (i32, i32) {
    %c0_i32 = arith.constant 0 : i32
    %c0_i32_0 = arith.constant 0 : i32
    %c0_i32_1 = arith.constant 0 : i32
    return %c0_i32, %c0_i32_0 : i32, i32
  }
  func.func @transform_5(%arg0: i32) -> (i32, i32) {
    %c0_i32 = arith.constant 0 : i32
    %c0_i32_0 = arith.constant 0 : i32
    return %arg0, %c0_i32 : i32, i32
  }
}

</mosaic_0001>

<bundles_post_ra>
// kernel: tpu_custom_call.1
= control target key start
LH: loop header
LB: loop body
LE: loop exit
PB: predicated region body
PF: predicated region fallthrough
CT: control target
= control target key end

     0   :  { %10 = vsyncpa [#allocation3], 0  ;;  %s432_s0 = inlined_call_operand.hbm [shape: bf16[16,16], index: 0, kind: input, shape index: {}]   ;;  %s433_s1 = inlined_call_operand.hbm [shape: bf16[16,128], index: 1, kind: input, shape index: {}]   ;;  %s434_s2 = inlined_call_operand.vmem [shape: f32[1,128], index: 2, kind: input, shape index: {}]   ;;  %s435_s3 = inlined_call_operand.hbm [shape: bf16[128,128], index: 3, kind: input, shape index: {}]   ;;  %s436_s4 = inlined_call_operand.vmem [shape: f32[1,128], index: 4, kind: input, shape index: {}]   ;;  %s437_s5 = inlined_call_operand.hbm [shape: f32[16,128], index: 5, kind: output, shape index: {}]  }
   0x1   :  { %11 = vsyncpa [#allocation6], 0 }
   0x2   :  { %12 = vsyncpa [#allocation4], 0  ;;  %s30_s20 = sshll.u32 %s433_s1, 4  ;;  %s376_s21 = smov [#allocation5]   ;;  %s31_s20 = int_to_ptr.hbm [resolvable:$true] %s30_s20 }
   0x3   :  { %s32_s22 = sshll.u32 %s376_s21, 4  ;;  %s17_s25 = sshll.u32 %s432_s0, 4  ;;  %s33_s22 = int_to_ptr.vmem [resolvable:$true] %s32_s22  ;;  %s18_s25 = int_to_ptr.hbm [resolvable:$true] %s17_s25 }
   0x4   :  { %s377_s26 = smov 64   ;;  %s378_s27 = smov 4  }
   0x5   :  { %38 = dma.hbm_to_vmem [thread:$0]  %s31_s20, 128, %s33_s22, [#allocation6], %s377_s26, %s377_s26, %s378_s27  }
   0x6   :  { %s379_s28 = smov [#allocation2]   ;;  %s45_s7 = sshll.u32 %s435_s3, 4  ;;  %s46_s7 = int_to_ptr.hbm [resolvable:$true] %s45_s7 }
   0x7   :  { %s19_s29 = sshll.u32 %s379_s28, 4  ;;  %s380_s1 = smov [#allocation7]   ;;  %s20_s29 = int_to_ptr.vmem [resolvable:$true] %s19_s29 }
   0x8   :  { %25 = dma.hbm_to_vmem [thread:$0]  %s18_s25, 128, %s20_s29, [#allocation3], %s377_s26, %s377_s26, %s378_s27  }
   0x9   :  { %s47_s8 = sshll.u32 %s380_s1, 4  ;;  %s48_s8 = int_to_ptr.vmem [resolvable:$true] %s47_s8 }
   0xa   :  { %53 = dma.hbm_to_vmem [thread:$0]  %s46_s7, 1024, %s48_s8, [#allocation6], %s377_s26, %s377_s26, %s378_s27  }
   0xb   :  { %370 = dma.done.wait [#allocation3], 128  }
   0xc   :  { %371 = vsyncadd [#allocation3], 4294967168 }
   0xd   :  { %372 = dma.done.wait [#allocation6], 1152  }
   0xe   :  { %373 = vsyncadd [#allocation6], 4294966144  ;;  %v255_v0 = vld [vmem:[#allocation5] sm:$0xff]  ;;  %v254_v2 = vld [vmem:[#allocation2] sm:$0xff]  ;;  %vm88_vm0 = vcmask 130048   ;;  %s381_s11 = smov [#allocation8]  }
   0xf   :  { %v263_v1 = vld [vmem:[#allocation7 + $0x38] sm:$0xff]  ;;  %99 = vmatpush.bf16.msra.mxu0 %v255_v0  ;;  %v262_v3 = vld [vmem:[#allocation7 + $0x30] sm:$0xff]  ;;  %v261_v4 = vld [vmem:[#allocation7 + $0x28] sm:$0xff]  ;;  %s197_s12 = sshll.u32 %s381_s11, 4  ;;  %s382_s15 = smov 128   ;;  %s198_s12 = int_to_ptr.vmem [resolvable:$true] %s197_s12 }
  0x10   :  { %177 = vmatpush.bf16.msra.mxu1 %v263_v1  ;;  %v260_v5 = vld [vmem:[#allocation7 + $0x20] sm:$0xff]  ;;  %v259_v6 = vld [vmem:[#allocation7 + $0x18] sm:$0xff]  ;;  %v258_v7 = vld [vmem:[#allocation7 + $0x10] sm:$0xff]  ;;  %s383_s16 = smov 8  }
  0x11   :  { %v257_v8 = vld [vmem:[#allocation7 + $0x8] sm:$0xff]  ;;  %v256_v9 = vld [vmem:[#allocation7] sm:$0xff]  ;;  %v272_v11 = vld [vmem:[%s434_s2] ss:$0 sm:$0xff]  ;;  %s199_s2 = sshll.u32 %s437_s5, 4  ;;  %s200_s2 = int_to_ptr.hbm [resolvable:$true] %s199_s2 }
  0x12   :  { %221 = vmatmul.msk.bf16.vlgmr.msra.gmra.mxu0 %vm88_vm0, %v254_v2  ;;  %v273_v18 = vld [vmem:[%s436_s4] ss:$0 sm:$0xff] }
  0x14   :  { %178 = vmatpush.bf16.msra.mxu1 %v262_v3 }
  0x18   :  { %179 = vmatpush.bf16.msra.mxu1 %v261_v4 }
  0x1c   :  { %180 = vmatpush.bf16.msra.mxu1 %v260_v5 }
  0x20   :  { %181 = vmatpush.bf16.msra.mxu1 %v259_v6 }
  0x24   :  { %182 = vmatpush.bf16.msra.mxu1 %v258_v7 }
  0x28   :  { %183 = vmatpush.bf16.msra.mxu1 %v257_v8 }
  0x2c   :  { %184 = vmatpush.bf16.msra.mxu1 %v256_v9 }
  0x8f   :  { %v101_v10 = vpop.f32.mrf.mxu0 }
  0x90   :  { %v102_v12 = vadd.f32 %v272_v11, %v101_v10 }
  0x92   :  { %v106_v15 = vmax.f32 %v102_v12, 0.0 }
  0x97   :  { %v103_v13 = vpop.f32.mrf.mxu0 }
  0x98   :  { %v104_v14 = vadd.f32 %v272_v11, %v103_v13 }
  0x9a   :  { %v107_v16 = vmax.f32 %v104_v14, 0.0 }
  0x9c   :  { %v108_v17 = vpack.c.bf16 %v107_v16, %v106_v15 }
  0x9e   :  { %185 = vmatmul.bf16.vlgmr.msra.gmra.mxu1 %v108_v17 }
 0x11b   :  { %v186_v19 = vpop.f32.mrf.mxu1 }
 0x11c   :  { %v187_v20 = vadd.f32 %v273_v18, %v186_v19 }
 0x11e   :  { %191 = vst [vmem:[#allocation8] sm:$0xff] %v187_v20 }
 0x123   :  { %v188_v21 = vpop.f32.mrf.mxu1 }
 0x124   :  { %v189_v22 = vadd.f32 %v273_v18, %v188_v21 }
 0x126   :  { %192 = vst [vmem:[#allocation8 + $0x8] sm:$0xff] %v189_v22 }
 0x127   :  { %205 = dma.vmem_to_hbm [thread:$0]  %s198_s12, 256, %s200_s2, [#allocation4], %s382_s15, %s382_s15, %s383_s16  }
 0x128   :  { %374 = dma.done.wait [#allocation4], 256  }
 0x129   :  { %375 = vsyncadd [#allocation4], 4294967040 }
 0x12a   :  { %210 = vsyncpa [#allocation3], 1 }
 0x12b   :  { %211 = vsyncpa [#allocation6], 1 }
 0x12c   :  { %212 = vsyncpa [#allocation4], 1 }

</bundles_post_ra>
